<compile_context>
chip_gen: v5e
topology: v5e:2x2
jax: 0.10.0
libtpu: 0.0.40
codegen_flags: <defaults>
</compile_context>

<pallas_src>
import jax
import jax.numpy as jnp
from jax.experimental import pallas as pl
from jax.experimental.pallas import tpu as pltpu


def _linear_kernel(w_ref, b_ref, x_ref, o_ref):
    # w_ref: SMEM (C, 3)   PyTorch-layout weight, read as scalars
    # b_ref: SMEM (C,)     bias, read as scalars
    # x_ref: VMEM (3, TB)  features on sublanes, batch tile on lanes
    # o_ref: VMEM (C, TB)  lane-dense output tile
    x0 = x_ref[0:1, :]                     # (1, TB)
    x1 = x_ref[1:2, :]
    x2 = x_ref[2:3, :]
    C = o_ref.shape[0]
    for c in range(C):                     # unrolled at trace time (C is tiny)
        row = (x0 * w_ref[c, 0]
               + x1 * w_ref[c, 1]
               + x2 * w_ref[c, 2]
               + b_ref[c])                 # 3 VPU FMAs + bias, full lane width
        o_ref[c:c + 1, :] = row.astype(o_ref.dtype)


def ultra_simple_nn(x, weight, bias, *, tb_max=4096):
    """Forward of UltraSimpleNN: (x.T[:3,:].T) @ weight.T + bias.

    x: (B, F) with F >= 3, weight: (C, 3), bias: (C,)  -> (B, C) float32.
    """
    B, F = x.shape
    C = weight.shape[0]
    assert F >= 3, "UltraSimpleNN uses the first 3 input features (F >= 3)"
    assert weight.shape == (C, 3) and bias.shape == (C,)

    LANE = 128
    # Lane-dense layout: batch on the lane axis (wrapper-side layout plumbing).
    x3t = x[:, :3].T.astype(jnp.float32)                       # (3, B)

    # Batch tile: multiple of 128, capped so VMEM stays tiny even on v7x
    # ((3+C)*TB*4 bytes * 2 buffers ~= 200 KiB at TB=4096).
    tb = min(tb_max, ((B + LANE - 1) // LANE) * LANE)
    Bp = ((B + tb - 1) // tb) * tb
    if Bp != B:
        x3t = jnp.pad(x3t, ((0, 0), (0, Bp - B)))              # (3, Bp)

    grid = (Bp // tb,)

    out_t = pl.pallas_call(
        _linear_kernel,
        out_shape=jax.ShapeDtypeStruct((C, Bp), jnp.float32),
        grid_spec=pltpu.PrefetchScalarGridSpec(
            num_scalar_prefetch=2,          # weight, bias -> SMEM scalars
            grid=grid,
            in_specs=[
                pl.BlockSpec((3, tb), lambda i, w, b: (0, i)),  # x tile
            ],
            out_specs=pl.BlockSpec((C, tb), lambda i, w, b: (0, i)),
        ),
        compiler_params=pltpu.CompilerParams(
            dimension_semantics=("parallel",),   # batch tiles are independent
        ),
        cost_estimate=pl.CostEstimate(
            flops=6 * C * B,
            transcendentals=0,
            bytes_accessed=4 * (3 * B + C * B + 3 * C + C),
        ),
    )(weight.astype(jnp.float32), bias.astype(jnp.float32), x3t)

    return out_t[:, :B].T                                       # (B, C)


if __name__ == "__main__":
    key = jax.random.PRNGKey(0)
    kx, kw, kb, kx2 = jax.random.split(key, 4)

    # Iris-like setup: input_size=4 features, output_size=3 classes.
    B, F, C = 8, 4, 3
    x = jax.random.normal(kx, (B, F), dtype=jnp.float32)

    # nn.Linear(3, C)-style init: uniform(-1/sqrt(3), 1/sqrt(3)).
    bound = 1.0 / jnp.sqrt(3.0)
    weight = jax.random.uniform(kw, (C, 3), minval=-bound, maxval=bound,
                                dtype=jnp.float32)
    bias = jax.random.uniform(kb, (C,), minval=-bound, maxval=bound,
                              dtype=jnp.float32)

    out = ultra_simple_nn(x, weight, bias)
    out = jax.block_until_ready(out)
    ref = x[:, :3] @ weight.T + bias
    assert out.shape == (B, C)
    assert jnp.allclose(out, ref, atol=1e-5, rtol=1e-5)

    # Exercise the multi-tile + ragged-batch path (grid=(3,), padded tail).
    B2 = 300
    x2 = jax.random.normal(kx2, (B2, F), dtype=jnp.float32)
    out2 = ultra_simple_nn(x2, weight, bias, tb_max=128)
    out2 = jax.block_until_ready(out2)
    ref2 = x2[:, :3] @ weight.T + bias
    assert out2.shape == (B2, C)
    assert jnp.allclose(out2, ref2, atol=1e-5, rtol=1e-5)

    print("KERNEL_OK")
</pallas_src>

<mosaic_0001>
module attributes {stable_mosaic.version = 11 : i64} {
  func.func @_linear_kernel(%arg0: i32, %arg1: memref<3x3xf32, #tpu.memory_space<smem>>, %arg2: memref<3xf32, #tpu.memory_space<smem>>, %arg3: memref<3x128xf32, #tpu.memory_space<vmem>>, %arg4: memref<3x128xf32, #tpu.memory_space<vmem>>) attributes {dimension_semantics = [#tpu.dimension_semantics<parallel>], iteration_bounds = array<i64: 1>, scalar_prefetch = 2 : i64, scratch_operands = 0 : i64, tpu.core_type = #tpu.core_type<tc>, window_params = [{transform_indices = @transform_0, window_bounds = array<i64: 3, 128>}, {transform_indices = @transform_1, window_bounds = array<i64: 3, 128>}]} {
    %c0 = arith.constant 0 : index
    %c0_0 = arith.constant 0 : index
    %0 = vector.load %arg3[%c0, %c0_0] : memref<3x128xf32, #tpu.memory_space<vmem>>, vector<1x128xf32>
    %c1 = arith.constant 1 : index
    %c0_1 = arith.constant 0 : index
    %1 = vector.load %arg3[%c1, %c0_1] : memref<3x128xf32, #tpu.memory_space<vmem>>, vector<1x128xf32>
    %c2 = arith.constant 2 : index
    %c0_2 = arith.constant 0 : index
    %2 = vector.load %arg3[%c2, %c0_2] : memref<3x128xf32, #tpu.memory_space<vmem>>, vector<1x128xf32>
    %c0_3 = arith.constant 0 : index
    %c0_4 = arith.constant 0 : index
    %3 = memref.load %arg1[%c0_3, %c0_4] : memref<3x3xf32, #tpu.memory_space<smem>>
    %4 = vector.broadcast %3 : f32 to vector<1x128xf32>
    %5 = arith.mulf %0, %4 : vector<1x128xf32>
    %c0_5 = arith.constant 0 : index
    %c1_6 = arith.constant 1 : index
    %6 = memref.load %arg1[%c0_5, %c1_6] : memref<3x3xf32, #tpu.memory_space<smem>>
    %7 = vector.broadcast %6 : f32 to vector<1x128xf32>
    %8 = arith.mulf %1, %7 : vector<1x128xf32>
    %9 = arith.addf %5, %8 : vector<1x128xf32>
    %c0_7 = arith.constant 0 : index
    %c2_8 = arith.constant 2 : index
    %10 = memref.load %arg1[%c0_7, %c2_8] : memref<3x3xf32, #tpu.memory_space<smem>>
    %11 = vector.broadcast %10 : f32 to vector<1x128xf32>
    %12 = arith.mulf %2, %11 : vector<1x128xf32>
    %13 = arith.addf %9, %12 : vector<1x128xf32>
    %c0_9 = arith.constant 0 : index
    %14 = memref.load %arg2[%c0_9] : memref<3xf32, #tpu.memory_space<smem>>
    %15 = vector.broadcast %14 : f32 to vector<1x128xf32>
    %16 = arith.addf %13, %15 : vector<1x128xf32>
    %c0_10 = arith.constant 0 : index
    %c0_11 = arith.constant 0 : index
    %17 = vector.load %arg4[%c0_10, %c0_11] : memref<3x128xf32, #tpu.memory_space<vmem>>, vector<1x128xf32>
    tpu.vector_store %arg4[%c0_10, %c0_11], %16 {strides = array<i32>} : memref<3x128xf32, #tpu.memory_space<vmem>>, vector<1x128xf32>,
    %c1_12 = arith.constant 1 : index
    %c0_13 = arith.constant 0 : index
    %18 = memref.load %arg1[%c1_12, %c0_13] : memref<3x3xf32, #tpu.memory_space<smem>>
    %19 = vector.broadcast %18 : f32 to vector<1x128xf32>
    %20 = arith.mulf %0, %19 : vector<1x128xf32>
    %c1_14 = arith.constant 1 : index
    %c1_15 = arith.constant 1 : index
    %21 = memref.load %arg1[%c1_14, %c1_15] : memref<3x3xf32, #tpu.memory_space<smem>>
    %22 = vector.broadcast %21 : f32 to vector<1x128xf32>
    %23 = arith.mulf %1, %22 : vector<1x128xf32>
    %24 = arith.addf %20, %23 : vector<1x128xf32>
    %c1_16 = arith.constant 1 : index
    %c2_17 = arith.constant 2 : index
    %25 = memref.load %arg1[%c1_16, %c2_17] : memref<3x3xf32, #tpu.memory_space<smem>>
    %26 = vector.broadcast %25 : f32 to vector<1x128xf32>
    %27 = arith.mulf %2, %26 : vector<1x128xf32>
    %28 = arith.addf %24, %27 : vector<1x128xf32>
    %c1_18 = arith.constant 1 : index
    %29 = memref.load %arg2[%c1_18] : memref<3xf32, #tpu.memory_space<smem>>
    %30 = vector.broadcast %29 : f32 to vector<1x128xf32>
    %31 = arith.addf %28, %30 : vector<1x128xf32>
    %c1_19 = arith.constant 1 : index
    %c0_20 = arith.constant 0 : index
    %32 = vector.load %arg4[%c1_19, %c0_20] : memref<3x128xf32, #tpu.memory_space<vmem>>, vector<1x128xf32>
    tpu.vector_store %arg4[%c1_19, %c0_20], %31 {strides = array<i32>} : memref<3x128xf32, #tpu.memory_space<vmem>>, vector<1x128xf32>,
    %c2_21 = arith.constant 2 : index
    %c0_22 = arith.constant 0 : index
    %33 = memref.load %arg1[%c2_21, %c0_22] : memref<3x3xf32, #tpu.memory_space<smem>>
    %34 = vector.broadcast %33 : f32 to vector<1x128xf32>
    %35 = arith.mulf %0, %34 : vector<1x128xf32>
    %c2_23 = arith.constant 2 : index
    %c1_24 = arith.constant 1 : index
    %36 = memref.load %arg1[%c2_23, %c1_24] : memref<3x3xf32, #tpu.memory_space<smem>>
    %37 = vector.broadcast %36 : f32 to vector<1x128xf32>
    %38 = arith.mulf %1, %37 : vector<1x128xf32>
    %39 = arith.addf %35, %38 : vector<1x128xf32>
    %c2_25 = arith.constant 2 : index
    %c2_26 = arith.constant 2 : index
    %40 = memref.load %arg1[%c2_25, %c2_26] : memref<3x3xf32, #tpu.memory_space<smem>>
    %41 = vector.broadcast %40 : f32 to vector<1x128xf32>
    %42 = arith.mulf %2, %41 : vector<1x128xf32>
    %43 = arith.addf %39, %42 : vector<1x128xf32>
    %c2_27 = arith.constant 2 : index
    %44 = memref.load %arg2[%c2_27] : memref<3xf32, #tpu.memory_space<smem>>
    %45 = vector.broadcast %44 : f32 to vector<1x128xf32>
    %46 = arith.addf %43, %45 : vector<1x128xf32>
    %c2_28 = arith.constant 2 : index
    %c0_29 = arith.constant 0 : index
    %47 = vector.load %arg4[%c2_28, %c0_29] : memref<3x128xf32, #tpu.memory_space<vmem>>, vector<1x128xf32>
    tpu.vector_store %arg4[%c2_28, %c0_29], %46 {strides = array<i32>} : memref<3x128xf32, #tpu.memory_space<vmem>>, vector<1x128xf32>,
    return
  }
  func.func @transform_0(%arg0: i32, %arg1: memref<3x3xf32, #tpu.memory_space<smem>>, %arg2: memref<3xf32, #tpu.memory_space<smem>>) -> (i32, i32) {
    %c0_i32 = arith.constant 0 : i32
    %c0_i32_0 = arith.constant 0 : i32
    return %c0_i32, %arg0 : i32, i32
  }
  func.func @transform_1(%arg0: i32, %arg1: memref<3x3xf32, #tpu.memory_space<smem>>, %arg2: memref<3xf32, #tpu.memory_space<smem>>) -> (i32, i32) {
    %c0_i32 = arith.constant 0 : i32
    %c0_i32_0 = arith.constant 0 : i32
    return %c0_i32, %arg0 : i32, i32
  }
}

</mosaic_0001>

<bundles_post_ra>
// kernel: tpu_custom_call.1
= control target key start
LH: loop header
LB: loop body
LE: loop exit
PB: predicated region body
PF: predicated region fallthrough
CT: control target
= control target key end

     0   :  { %s195_s18 = smov [#allocation3]   ;;  %s196_s19 = smov [#allocation4]   ;;  %s231_s0 = inlined_call_operand.hbm [shape: f32[3,3], index: 0, kind: input, shape index: {}]   ;;  %s232_s2 = inlined_call_operand.hbm [shape: f32[3,128], index: 2, kind: input, shape index: {}]   ;;  %s233_s3 = inlined_call_operand.hbm [shape: f32[3,128], index: 3, kind: output, shape index: {}]   ;;  %s234_s1 = inlined_call_operand.hbm [shape: f32[3], index: 1, kind: input, shape index: {}]  }
   0x1   :  { %s9_s14 = sshll.u32 %s231_s0, 4  ;;  %s14_s17 = sshll.u32 %s234_s1, 4  ;;  %s10_s14 = int_to_ptr.hbm [resolvable:$true] %s9_s14  ;;  %s15_s17 = int_to_ptr.hbm [resolvable:$true] %s14_s17 }
   0x2   :  { %12 = dma.hbm_to_smem %s10_s14, 64, %s195_s18, [#allocation2] }
   0x3   :  { %17 = dma.hbm_to_smem %s15_s17, 16, %s196_s19, [#allocation2] }
   0x4   :  { %189 = dma.done.wait [#allocation2], 80 }
   0x5   :  { %190 = vsyncadd [#allocation2], 4294967216 }
   0x6   :  { %20 = sfence }
   0x7   :  { %21 = vsyncpa [#allocation6], 0 }
   0x8   :  { %22 = vsyncpa [#allocation7], 0  ;;  %s28_s22 = sshll.u32 %s232_s2, 4  ;;  %s197_s0 = smov [#allocation5]   ;;  %s29_s22 = int_to_ptr.hbm [resolvable:$true] %s28_s22 }
   0x9   :  { %s30_s23 = sshll.u32 %s197_s0, 4  ;;  %s31_s23 = int_to_ptr.vmem [resolvable:$true] %s30_s23 }
   0xa   :  { %33 = dma.hbm_to_vmem [thread:$0]  %s29_s22, 64, %s31_s23, [#allocation6]  }
   0xb   :  { %191 = dma.done.wait [#allocation6], 64  }
   0xc   :  { %192 = vsyncadd [#allocation6], 4294967232  ;;  %s41_s1 = sld [smem:[#allocation3]]  ;;  %v38_v0 = vld [vmem:[#allocation5] sm:$0x1]  ;;  %s198_s7 = smov [#allocation8]  }
   0xd   :  { %s103_s24 = sld [smem:[#allocation3 + $0x1]]  ;;  %v39_v1 = vld [vmem:[#allocation5 + $0x1] sm:$0x1]  ;;  %v40_v2 = vld [vmem:[#allocation5 + $0x2] sm:$0x1]  ;;  %s91_s8 = sshll.u32 %s198_s7, 4  ;;  %s92_s8 = int_to_ptr.vmem [resolvable:$true] %s91_s8 }
   0xe   :  { %s104_s25 = sld [smem:[#allocation3 + $0x2]]  ;;  %s93_s11 = sshll.u32 %s233_s3, 4  ;;  %s94_s11 = int_to_ptr.hbm [resolvable:$true] %s93_s11 }
   0xf   :  { %s52_s26 = sld [smem:[#allocation4]] }
  0x10   :  { %s105_s27 = sld [smem:[#allocation3 + $0x80]] }
  0x11   :  { %s106_s28 = sld [smem:[#allocation3 + $0x81]] }
  0x12   :  { %v42_v3 = vstv %s41_s1  ;;  %s107_s2 = sld [smem:[#allocation3 + $0x82]] }
  0x13   :  { %v43_v4 = vmul.f32 %v42_v3, %v38_v0  ;;  %v45_v5 = vstv %s103_s24  ;;  %s108_s29 = sld [smem:[#allocation4 + $0x1]] }
  0x14   :  { %v46_v6 = vmul.f32 %v45_v5, %v39_v1  ;;  %v49_v7 = vstv %s104_s25  ;;  %s109_s30 = sld [smem:[#allocation3 + $0x100]] }
  0x15   :  { %v50_v8 = vmul.f32 %v49_v7, %v40_v2  ;;  %s110_s4 = sld [smem:[#allocation3 + $0x101]]  ;;  %v53_v11 = vstv %s52_s26 }
  0x16   :  { %v47_v9 = vadd.f32 %v46_v6, %v43_v4  ;;  %v57_v10 = vstv %s105_s27  ;;  %s111_s5 = sld [smem:[#allocation3 + $0x102]] }
  0x17   :  { %v58_v12 = vmul.f32 %v57_v10, %v38_v0  ;;  %v60_v13 = vstv %s106_s28  ;;  %s112_s6 = sld [smem:[#allocation4 + $0x2]] }
  0x18   :  { %v51_v14 = vadd.f32 %v50_v8, %v47_v9  ;;  %v61_v15 = vmul.f32 %v60_v13, %v39_v1  ;;  %v64_v16 = vstv %s107_s2 }
  0x19   :  { %v65_v19 = vmul.f32 %v64_v16, %v40_v2  ;;  %v68_v20 = vstv %s108_s29 }
  0x1a   :  { %v54_v17 = vadd.f32 %v53_v11, %v51_v14  ;;  %v62_v18 = vadd.f32 %v61_v15, %v58_v12  ;;  %v72_v21 = vstv %s109_s30 }
  0x1b   :  { %v73_v23 = vmul.f32 %v72_v21, %v38_v0  ;;  %v75_v24 = vstv %s110_s4 }
  0x1c   :  { %55 = vst [vmem:[#allocation8] sm:$0x1] %v54_v17  ;;  %v66_v22 = vadd.f32 %v65_v19, %v62_v18  ;;  %v76_v25 = vmul.f32 %v75_v24, %v39_v1  ;;  %v79_v26 = vstv %s111_s5 }
  0x1d   :  { %v80_v28 = vmul.f32 %v79_v26, %v40_v2  ;;  %v83_v30 = vstv %s112_s6 }
  0x1e   :  { %v69_v27 = vadd.f32 %v68_v20, %v66_v22  ;;  %v77_v29 = vadd.f32 %v76_v25, %v73_v23 }
  0x20   :  { %70 = vst [vmem:[#allocation8 + $0x1] sm:$0x1] %v69_v27  ;;  %v81_v31 = vadd.f32 %v80_v28, %v77_v29 }
  0x22   :  { %v84_v32 = vadd.f32 %v83_v30, %v81_v31 }
  0x24   :  { %85 = vst [vmem:[#allocation8 + $0x2] sm:$0x1] %v84_v32 }
  0x25   :  { %96 = dma.vmem_to_hbm [thread:$0]  %s92_s8, 64, %s94_s11, [#allocation7]  }
  0x26   :  { %193 = dma.done.wait [#allocation7], 64  }
  0x27   :  { %194 = vsyncadd [#allocation7], 4294967232 }
  0x28   :  { %101 = vsyncpa [#allocation6], 1 }
  0x29   :  { %102 = vsyncpa [#allocation7], 1 }

</bundles_post_ra>
